<compile_context>
chip_gen: v6e
topology: v6e:2x2x1
jax: 0.10.0
libtpu: 0.0.40
codegen_flags: <defaults>
</compile_context>

<pallas_src>
import jax
import jax.numpy as jnp
from jax.experimental import pallas as pl
from jax.experimental.pallas import tpu as pltpu


INPUT_DIM = 256
LATENT_DIM = 8
HIDDEN_1 = INPUT_DIM // 2   # 128
HIDDEN_2 = INPUT_DIM // 4   # 64
HEADS_DIM = 2 * LATENT_DIM  # fused mu|log_var head width (16)

MAX_TILE_B = 512            # batch-tile rows (safe on v5e/v6e/v7x scoped-VMEM defaults)


def _round_up(n, m):
    return (n + m - 1) // m * m


def _cdiv(a, b):
    return (a + b - 1) // b


# ---- packed-bias layout: each segment starts on a 128-lane boundary -----------------
_BIAS_WIDTHS = (
    ("b1", HIDDEN_1),
    ("b2", HIDDEN_2),
    ("bh", HEADS_DIM),
    ("bd1", HIDDEN_2),
    ("bd2", HIDDEN_1),
    ("bd3", INPUT_DIM),
)
_OFF = {}
_off = 0
for _name, _w in _BIAS_WIDTHS:
    _OFF[_name] = _off
    _off += _round_up(_w, 128)
_BIAS_TOTAL = _off  # 896


def _vae_kernel(x_ref, eps_t_ref,
                w1_ref, w2_ref, wh_ref, wd1_ref, wd2_ref, wd3_ref, bias_ref,
                recon_ref, heads_t_ref):
    f32 = jnp.float32
    bf16 = jnp.bfloat16

    # Static slices of the packed (1, 896) bias slab (128-lane aligned, free).
    b1 = bias_ref[:, _OFF["b1"]:_OFF["b1"] + HIDDEN_1]
    b2 = bias_ref[:, _OFF["b2"]:_OFF["b2"] + HIDDEN_2]
    bh = bias_ref[:, _OFF["bh"]:_OFF["bh"] + HEADS_DIM]
    bd1 = bias_ref[:, _OFF["bd1"]:_OFF["bd1"] + HIDDEN_2]
    bd2 = bias_ref[:, _OFF["bd2"]:_OFF["bd2"] + HIDDEN_1]
    bd3 = bias_ref[:, _OFF["bd3"]:_OFF["bd3"] + INPUT_DIM]

    x = x_ref[...].astype(bf16)

    # ---- encoder: Linear -> ReLU -> Linear -> ReLU (bf16 MXU operands, f32 accum) ----
    h1 = jnp.dot(x, w1_ref[...], preferred_element_type=f32) + b1
    h1 = jnp.maximum(h1, 0.0)
    h2 = jnp.dot(h1.astype(bf16), w2_ref[...], preferred_element_type=f32) + b2
    h2 = jnp.maximum(h2, 0.0)

    # ---- fused mu | log_var head (single small matmul) ----
    heads = jnp.dot(h2.astype(bf16), wh_ref[...], preferred_element_type=f32) + bh
    mu = heads[:, :LATENT_DIM]
    log_var = heads[:, LATENT_DIM:]

    # ---- reparameterize: z = mu + eps * exp(0.5 * log_var) ----
    # eps arrives lane-dense as (LATENT, tb); transpose via the XLU (idle slot).
    eps = jnp.transpose(eps_t_ref[...])
    z = mu + eps * jnp.exp(0.5 * log_var)

    # ---- decoder: Linear -> ReLU -> Linear -> ReLU -> Linear -> Tanh, then * 6 ----
    d1 = jnp.dot(z.astype(bf16), wd1_ref[...], preferred_element_type=f32) + bd1
    d1 = jnp.maximum(d1, 0.0)
    d2 = jnp.dot(d1.astype(bf16), wd2_ref[...], preferred_element_type=f32) + bd2
    d2 = jnp.maximum(d2, 0.0)
    d3 = jnp.dot(d2.astype(bf16), wd3_ref[...], preferred_element_type=f32) + bd3
    recon = jnp.tanh(d3) * 6.0

    recon_ref[...] = recon.astype(recon_ref.dtype)
    # Emit the tiny head slab lane-dense as (HEADS_DIM, tb).
    heads_t_ref[...] = jnp.transpose(heads).astype(heads_t_ref.dtype)


def prepare_params(params):
    """One-time layout prep, OUTSIDE the hot path:
    - transpose PyTorch (out, in) weights -> (in, out) and cast to bf16 for the MXU,
    - fuse mu / log_var head weights into one (H2, 2*L) matrix,
    - pack all six biases (kept f32) into a single lane-aligned (1, 896) slab."""
    def wt(name):
        return jnp.transpose(params[name]).astype(jnp.bfloat16)

    bias_all = jnp.zeros((1, _BIAS_TOTAL), jnp.float32)

    def put(dst, key, vec):
        vec = vec.astype(jnp.float32).reshape(1, -1)
        return dst.at[:, _OFF[key]:_OFF[key] + vec.shape[1]].set(vec)

    bias_all = put(bias_all, "b1", params["enc_b1"])
    bias_all = put(bias_all, "b2", params["enc_b2"])
    bias_all = put(bias_all, "bh", jnp.concatenate([params["mu_b"], params["lv_b"]]))
    bias_all = put(bias_all, "bd1", params["dec_b1"])
    bias_all = put(bias_all, "bd2", params["dec_b2"])
    bias_all = put(bias_all, "bd3", params["dec_b3"])

    return {
        "w1": wt("enc_w1"),
        "w2": wt("enc_w2"),
        "wh": jnp.concatenate([wt("mu_w"), wt("lv_w")], axis=1),   # (H2, 2*L) bf16
        "wd1": wt("dec_w1"),
        "wd2": wt("dec_w2"),
        "wd3": wt("dec_w3"),
        "bias": bias_all,                                           # (1, 896) f32
    }


@jax.jit
def vae_forward(x, eps, prepared):
    """Full VAE forward pass in a single Pallas kernel.

    x: (B, INPUT_DIM) f32, eps: (B, LATENT_DIM) f32, prepared: prepare_params() output.
    Returns (recon, mu, log_var) matching the torch module semantics.
    """
    B = x.shape[0]

    # Batch tile: >= 2 tiles for v7x megacore and ~4 grid steps for DMA overlap when the
    # batch is big enough; multi-tile tb must be a multiple of 128 so the lane-dim blocks
    # of the transposed eps / heads tensors stay legal & lane-dense.
    if B <= 128:
        tb = _round_up(max(B, 1), 8)                       # single tile
    else:
        tb = min(MAX_TILE_B, _round_up(_cdiv(B, 4), 128))  # >= 2 tiles, 128-aligned
    b_pad = _round_up(B, tb)
    if b_pad != B:
        x = jnp.pad(x, ((0, b_pad - B), (0, 0)))
        eps = jnp.pad(eps, ((0, b_pad - B), (0, 0)))
    n_tiles = b_pad // tb

    eps_t = jnp.transpose(eps)                             # (LATENT, b_pad), lane-dense

    p = prepared
    weight_inputs = (p["w1"], p["w2"], p["wh"], p["wd1"], p["wd2"], p["wd3"], p["bias"])

    in_specs = [
        pl.BlockSpec((tb, INPUT_DIM), lambda i: (i, 0)),       # x tile
        pl.BlockSpec((LATENT_DIM, tb), lambda i: (0, i)),      # eps (transposed)
    ]
    # Weights/biases: constant index_map -> VMEM-resident across all grid steps.
    in_specs += [pl.BlockSpec(tuple(w.shape), lambda i: (0, 0)) for w in weight_inputs]

    out_specs = (
        pl.BlockSpec((tb, INPUT_DIM), lambda i: (i, 0)),       # recon tile
        pl.BlockSpec((HEADS_DIM, tb), lambda i: (0, i)),       # mu|log_var (transposed)
    )

    # Advisory cost estimate (per padded batch).
    flops_per_row = 2 * (INPUT_DIM * HIDDEN_1 + HIDDEN_1 * HIDDEN_2 + HIDDEN_2 * HEADS_DIM
                         + LATENT_DIM * HIDDEN_2 + HIDDEN_2 * HIDDEN_1 + HIDDEN_1 * INPUT_DIM)
    weight_bytes = sum(int(w.size) * w.dtype.itemsize for w in weight_inputs)
    cost = pl.CostEstimate(
        flops=b_pad * flops_per_row,
        transcendentals=b_pad * (LATENT_DIM + INPUT_DIM),      # exp + tanh
        bytes_accessed=4 * b_pad * (INPUT_DIM + LATENT_DIM + INPUT_DIM + HEADS_DIM)
                       + weight_bytes,
    )

    recon, heads_t = pl.pallas_call(
        _vae_kernel,
        grid=(n_tiles,),
        out_shape=(
            jax.ShapeDtypeStruct((b_pad, INPUT_DIM), jnp.float32),    # recon
            jax.ShapeDtypeStruct((HEADS_DIM, b_pad), jnp.float32),    # mu | log_var (T)
        ),
        in_specs=in_specs,
        out_specs=out_specs,
        compiler_params=pltpu.CompilerParams(
            dimension_semantics=("parallel",)),
        cost_estimate=cost,
    )(x, eps_t, *weight_inputs)

    recon = recon[:B]
    mu = jnp.transpose(heads_t[:LATENT_DIM, :B])
    log_var = jnp.transpose(heads_t[LATENT_DIM:, :B])
    return recon, mu, log_var


def init_params(key):
    """Deterministic PyTorch-style (uniform +/- 1/sqrt(fan_in)) initialization,
    in PyTorch layout: weights (out, in), biases (out,)."""
    shapes = {
        "enc_w1": (HIDDEN_1, INPUT_DIM), "enc_b1": (HIDDEN_1,),
        "enc_w2": (HIDDEN_2, HIDDEN_1),  "enc_b2": (HIDDEN_2,),
        "mu_w":   (LATENT_DIM, HIDDEN_2), "mu_b":  (LATENT_DIM,),
        "lv_w":   (LATENT_DIM, HIDDEN_2), "lv_b":  (LATENT_DIM,),
        "dec_w1": (HIDDEN_2, LATENT_DIM), "dec_b1": (HIDDEN_2,),
        "dec_w2": (HIDDEN_1, HIDDEN_2),  "dec_b2": (HIDDEN_1,),
        "dec_w3": (INPUT_DIM, HIDDEN_1), "dec_b3": (INPUT_DIM,),
    }
    fan_in = {
        "enc_w1": INPUT_DIM, "enc_b1": INPUT_DIM,
        "enc_w2": HIDDEN_1,  "enc_b2": HIDDEN_1,
        "mu_w":   HIDDEN_2,  "mu_b":   HIDDEN_2,
        "lv_w":   HIDDEN_2,  "lv_b":   HIDDEN_2,
        "dec_w1": LATENT_DIM, "dec_b1": LATENT_DIM,
        "dec_w2": HIDDEN_2,  "dec_b2": HIDDEN_2,
        "dec_w3": HIDDEN_1,  "dec_b3": HIDDEN_1,
    }
    params = {}
    keys = jax.random.split(key, len(shapes))
    for k, name in zip(keys, sorted(shapes.keys())):
        bound = 1.0 / jnp.sqrt(jnp.float32(fan_in[name]))
        params[name] = jax.random.uniform(
            k, shapes[name], dtype=jnp.float32, minval=-bound, maxval=bound)
    return params


def vae_reference_f32(x, eps, params):
    """Pure-f32 JAX reference mirroring the PyTorch forward (semantic sanity check)."""
    relu = lambda v: jnp.maximum(v, 0.0)
    h = relu(x @ params["enc_w1"].T + params["enc_b1"])
    h = relu(h @ params["enc_w2"].T + params["enc_b2"])
    mu = h @ params["mu_w"].T + params["mu_b"]
    log_var = h @ params["lv_w"].T + params["lv_b"]
    z = mu + eps * jnp.exp(0.5 * log_var)
    d = relu(z @ params["dec_w1"].T + params["dec_b1"])
    d = relu(d @ params["dec_w2"].T + params["dec_b2"])
    recon = jnp.tanh(d @ params["dec_w3"].T + params["dec_b3"]) * 6.0
    return recon, mu, log_var


def vae_reference_bf16(x, eps, params):
    """Reference mirroring the kernel's dtype flow (bf16 matmul operands, f32 accum /
    elementwise) — used for a tight wiring/correctness check."""
    bf16, f32 = jnp.bfloat16, jnp.float32

    def lin(v, w_name, b_name):
        w = jnp.transpose(params[w_name]).astype(bf16)
        return jnp.dot(v.astype(bf16), w, preferred_element_type=f32) + params[b_name]

    relu = lambda v: jnp.maximum(v, 0.0)
    h = relu(lin(x, "enc_w1", "enc_b1"))
    h = relu(lin(h, "enc_w2", "enc_b2"))
    mu = lin(h, "mu_w", "mu_b")
    log_var = lin(h, "lv_w", "lv_b")
    z = mu + eps * jnp.exp(0.5 * log_var)
    d = relu(lin(z, "dec_w1", "dec_b1"))
    d = relu(lin(d, "dec_w2", "dec_b2"))
    recon = jnp.tanh(lin(d, "dec_w3", "dec_b3")) * 6.0
    return recon, mu, log_var


def _check(recon, mu, log_var, x, eps, params):
    # Tight check against a reference with the same bf16-operand / f32-accum dtype flow.
    r_m, mu_m, lv_m = vae_reference_bf16(x, eps, params)
    assert jnp.allclose(recon, r_m, atol=5e-3, rtol=5e-3)
    assert jnp.allclose(mu, mu_m, atol=5e-3, rtol=5e-3)
    assert jnp.allclose(log_var, lv_m, atol=5e-3, rtol=5e-3)
    # Loose semantic check against the pure-f32 reference (bf16 operand rounding).
    r_f, mu_f, lv_f = vae_reference_f32(x, eps, params)
    assert jnp.allclose(recon, r_f, atol=1e-1, rtol=1e-1)
    assert jnp.allclose(mu, mu_f, atol=1e-1, rtol=1e-1)
    assert jnp.allclose(log_var, lv_f, atol=1e-1, rtol=1e-1)


if __name__ == "__main__":
    key = jax.random.PRNGKey(0)
    k_param, k_x, k_eps = jax.random.split(key, 3)

    B = 8
    params = init_params(k_param)
    prepared = prepare_params(params)          # one-time layout prep, outside the hot path
    x = jax.random.normal(k_x, (B, INPUT_DIM), dtype=jnp.float32)
    eps = jax.random.normal(k_eps, (B, LATENT_DIM), dtype=jnp.float32)

    recon, mu, log_var = vae_forward(x, eps, prepared)
    jax.block_until_ready((recon, mu, log_var))
    assert recon.shape == (B, INPUT_DIM)
    assert mu.shape == (B, LATENT_DIM) and log_var.shape == (B, LATENT_DIM)
    _check(recon, mu, log_var, x, eps, params)

    # Second check: non-tile-aligned larger batch (exercises padding + multi-tile grid).
    B2 = 260
    x2 = jax.random.normal(jax.random.PRNGKey(1), (B2, INPUT_DIM), dtype=jnp.float32)
    eps2 = jax.random.normal(jax.random.PRNGKey(2), (B2, LATENT_DIM), dtype=jnp.float32)
    r2, mu2, lv2 = vae_forward(x2, eps2, prepared)
    jax.block_until_ready((r2, mu2, lv2))
    assert r2.shape == (B2, INPUT_DIM)
    _check(r2, mu2, lv2, x2, eps2, params)

    print("KERNEL_OK")
</pallas_src>

<mosaic_0001>
module attributes {stable_mosaic.version = 11 : i64} {
  func.func @_vae_kernel(%arg0: i32, %arg1: memref<8x256xf32, #tpu.memory_space<vmem>>, %arg2: memref<8x8xf32, #tpu.memory_space<vmem>>, %arg3: memref<256x128xbf16, #tpu.memory_space<vmem>>, %arg4: memref<128x64xbf16, #tpu.memory_space<vmem>>, %arg5: memref<64x16xbf16, #tpu.memory_space<vmem>>, %arg6: memref<8x64xbf16, #tpu.memory_space<vmem>>, %arg7: memref<64x128xbf16, #tpu.memory_space<vmem>>, %arg8: memref<128x256xbf16, #tpu.memory_space<vmem>>, %arg9: memref<1x896xf32, #tpu.memory_space<vmem>>, %arg10: memref<8x256xf32, #tpu.memory_space<vmem>>, %arg11: memref<16x8xf32, #tpu.memory_space<vmem>>) attributes {dimension_semantics = [#tpu.dimension_semantics<parallel>], iteration_bounds = array<i64: 1>, scalar_prefetch = 0 : i64, scratch_operands = 0 : i64, tpu.core_type = #tpu.core_type<tc>, window_params = [{transform_indices = @transform_0, window_bounds = array<i64: 8, 256>}, {transform_indices = @transform_1, window_bounds = array<i64: 8, 8>}, {pipeline_mode = #tpu.pipeline_mode<synchronous>, transform_indices = @transform_2, window_bounds = array<i64: 256, 128>}, {pipeline_mode = #tpu.pipeline_mode<synchronous>, transform_indices = @transform_3, window_bounds = array<i64: 128, 64>}, {pipeline_mode = #tpu.pipeline_mode<synchronous>, transform_indices = @transform_4, window_bounds = array<i64: 64, 16>}, {pipeline_mode = #tpu.pipeline_mode<synchronous>, transform_indices = @transform_5, window_bounds = array<i64: 8, 64>}, {pipeline_mode = #tpu.pipeline_mode<synchronous>, transform_indices = @transform_6, window_bounds = array<i64: 64, 128>}, {pipeline_mode = #tpu.pipeline_mode<synchronous>, transform_indices = @transform_7, window_bounds = array<i64: 128, 256>}, {pipeline_mode = #tpu.pipeline_mode<synchronous>, transform_indices = @transform_8, window_bounds = array<i64: 1, 896>}, {transform_indices = @transform_9, window_bounds = array<i64: 8, 256>}, {transform_indices = @transform_10, window_bounds = array<i64: 16, 8>}]} {
    %c0 = arith.constant 0 : index
    %c0_0 = arith.constant 0 : index
    %0 = vector.load %arg9[%c0, %c0_0] : memref<1x896xf32, #tpu.memory_space<vmem>>, vector<1x128xf32>
    %c0_1 = arith.constant 0 : index
    %c128 = arith.constant 128 : index
    %1 = vector.load %arg9[%c0_1, %c128] : memref<1x896xf32, #tpu.memory_space<vmem>>, vector<1x64xf32>
    %c0_2 = arith.constant 0 : index
    %c256 = arith.constant 256 : index
    %2 = vector.load %arg9[%c0_2, %c256] : memref<1x896xf32, #tpu.memory_space<vmem>>, vector<1x16xf32>
    %c0_3 = arith.constant 0 : index
    %c384 = arith.constant 384 : index
    %3 = vector.load %arg9[%c0_3, %c384] : memref<1x896xf32, #tpu.memory_space<vmem>>, vector<1x64xf32>
    %c0_4 = arith.constant 0 : index
    %c512 = arith.constant 512 : index
    %4 = vector.load %arg9[%c0_4, %c512] : memref<1x896xf32, #tpu.memory_space<vmem>>, vector<1x128xf32>
    %c0_5 = arith.constant 0 : index
    %c640 = arith.constant 640 : index
    %5 = vector.load %arg9[%c0_5, %c640] : memref<1x896xf32, #tpu.memory_space<vmem>>, vector<1x256xf32>
    %c0_6 = arith.constant 0 : index
    %c0_7 = arith.constant 0 : index
    %6 = vector.load %arg1[%c0_6, %c0_7] : memref<8x256xf32, #tpu.memory_space<vmem>>, vector<8x256xf32>
    %7 = arith.truncf %6 : vector<8x256xf32> to vector<8x256xbf16>
    %c0_8 = arith.constant 0 : index
    %c0_9 = arith.constant 0 : index
    %8 = vector.load %arg3[%c0_8, %c0_9] : memref<256x128xbf16, #tpu.memory_space<vmem>>, vector<256x128xbf16>
    %cst = arith.constant dense<0.000000e+00> : vector<8x128xf32>
    %9 = tpu.matmul %7, %8, %cst {dimension_numbers = #tpu.dot_dimension_numbers<[1], [0], [0], [1], [0, 0, 1, 1], [], []>} : vector<8x256xbf16>, vector<256x128xbf16>, vector<8x128xf32> -> vector<8x128xf32>
    %10 = vector.broadcast %0 : vector<1x128xf32> to vector<8x128xf32>
    %11 = arith.addf %9, %10 : vector<8x128xf32>
    %cst_10 = arith.constant 0.000000e+00 : f32
    %12 = vector.broadcast %cst_10 : f32 to vector<8x128xf32>
    %13 = arith.maximumf %11, %12 : vector<8x128xf32>
    %14 = arith.truncf %13 : vector<8x128xf32> to vector<8x128xbf16>
    %c0_11 = arith.constant 0 : index
    %c0_12 = arith.constant 0 : index
    %15 = vector.load %arg4[%c0_11, %c0_12] : memref<128x64xbf16, #tpu.memory_space<vmem>>, vector<128x64xbf16>
    %cst_13 = arith.constant dense<0.000000e+00> : vector<8x64xf32>
    %16 = tpu.matmul %14, %15, %cst_13 {dimension_numbers = #tpu.dot_dimension_numbers<[1], [0], [0], [1], [0, 0, 1, 1], [], []>} : vector<8x128xbf16>, vector<128x64xbf16>, vector<8x64xf32> -> vector<8x64xf32>
    %17 = vector.broadcast %1 : vector<1x64xf32> to vector<8x64xf32>
    %18 = arith.addf %16, %17 : vector<8x64xf32>
    %cst_14 = arith.constant 0.000000e+00 : f32
    %19 = vector.broadcast %cst_14 : f32 to vector<8x64xf32>
    %20 = arith.maximumf %18, %19 : vector<8x64xf32>
    %21 = arith.truncf %20 : vector<8x64xf32> to vector<8x64xbf16>
    %c0_15 = arith.constant 0 : index
    %c0_16 = arith.constant 0 : index
    %22 = vector.load %arg5[%c0_15, %c0_16] : memref<64x16xbf16, #tpu.memory_space<vmem>>, vector<64x16xbf16>
    %cst_17 = arith.constant dense<0.000000e+00> : vector<8x16xf32>
    %23 = tpu.matmul %21, %22, %cst_17 {dimension_numbers = #tpu.dot_dimension_numbers<[1], [0], [0], [1], [0, 0, 1, 1], [], []>} : vector<8x64xbf16>, vector<64x16xbf16>, vector<8x16xf32> -> vector<8x16xf32>
    %24 = vector.broadcast %2 : vector<1x16xf32> to vector<8x16xf32>
    %25 = arith.addf %23, %24 : vector<8x16xf32>
    %26 = vector.extract_strided_slice %25 {offsets = [0, 0], sizes = [8, 8], strides = [1, 1]} : vector<8x16xf32> to vector<8x8xf32>
    %27 = vector.extract_strided_slice %25 {offsets = [0, 8], sizes = [8, 8], strides = [1, 1]} : vector<8x16xf32> to vector<8x8xf32>
    %c0_18 = arith.constant 0 : index
    %c0_19 = arith.constant 0 : index
    %28 = vector.load %arg2[%c0_18, %c0_19] : memref<8x8xf32, #tpu.memory_space<vmem>>, vector<8x8xf32>
    %29 = tpu.transpose %28, [1, 0] : vector<8x8xf32> -> vector<8x8xf32>
    %cst_20 = arith.constant 5.000000e-01 : f32
    %30 = vector.broadcast %cst_20 : f32 to vector<8x8xf32>
    %31 = arith.mulf %30, %27 : vector<8x8xf32>
    %32 = math.exp %31 : vector<8x8xf32>
    %33 = arith.mulf %29, %32 : vector<8x8xf32>
    %34 = arith.addf %26, %33 : vector<8x8xf32>
    %35 = arith.truncf %34 : vector<8x8xf32> to vector<8x8xbf16>
    %c0_21 = arith.constant 0 : index
    %c0_22 = arith.constant 0 : index
    %36 = vector.load %arg6[%c0_21, %c0_22] : memref<8x64xbf16, #tpu.memory_space<vmem>>, vector<8x64xbf16>
    %cst_23 = arith.constant dense<0.000000e+00> : vector<8x64xf32>
    %37 = tpu.matmul %35, %36, %cst_23 {dimension_numbers = #tpu.dot_dimension_numbers<[1], [0], [0], [1], [0, 0, 1, 1], [], []>} : vector<8x8xbf16>, vector<8x64xbf16>, vector<8x64xf32> -> vector<8x64xf32>
    %38 = vector.broadcast %3 : vector<1x64xf32> to vector<8x64xf32>
    %39 = arith.addf %37, %38 : vector<8x64xf32>
    %cst_24 = arith.constant 0.000000e+00 : f32
    %40 = vector.broadcast %cst_24 : f32 to vector<8x64xf32>
    %41 = arith.maximumf %39, %40 : vector<8x64xf32>
    %42 = arith.truncf %41 : vector<8x64xf32> to vector<8x64xbf16>
    %c0_25 = arith.constant 0 : index
    %c0_26 = arith.constant 0 : index
    %43 = vector.load %arg7[%c0_25, %c0_26] : memref<64x128xbf16, #tpu.memory_space<vmem>>, vector<64x128xbf16>
    %cst_27 = arith.constant dense<0.000000e+00> : vector<8x128xf32>
    %44 = tpu.matmul %42, %43, %cst_27 {dimension_numbers = #tpu.dot_dimension_numbers<[1], [0], [0], [1], [0, 0, 1, 1], [], []>} : vector<8x64xbf16>, vector<64x128xbf16>, vector<8x128xf32> -> vector<8x128xf32>
    %45 = vector.broadcast %4 : vector<1x128xf32> to vector<8x128xf32>
    %46 = arith.addf %44, %45 : vector<8x128xf32>
    %cst_28 = arith.constant 0.000000e+00 : f32
    %47 = vector.broadcast %cst_28 : f32 to vector<8x128xf32>
    %48 = arith.maximumf %46, %47 : vector<8x128xf32>
    %49 = arith.truncf %48 : vector<8x128xf32> to vector<8x128xbf16>
    %c0_29 = arith.constant 0 : index
    %c0_30 = arith.constant 0 : index
    %50 = vector.load %arg8[%c0_29, %c0_30] : memref<128x256xbf16, #tpu.memory_space<vmem>>, vector<128x256xbf16>
    %cst_31 = arith.constant dense<0.000000e+00> : vector<8x256xf32>
    %51 = tpu.matmul %49, %50, %cst_31 {dimension_numbers = #tpu.dot_dimension_numbers<[1], [0], [0], [1], [0, 0, 1, 1], [], []>} : vector<8x128xbf16>, vector<128x256xbf16>, vector<8x256xf32> -> vector<8x256xf32>
    %52 = vector.broadcast %5 : vector<1x256xf32> to vector<8x256xf32>
    %53 = arith.addf %51, %52 : vector<8x256xf32>
    %54 = math.tanh %53 : vector<8x256xf32>
    %cst_32 = arith.constant 6.000000e+00 : f32
    %55 = vector.broadcast %cst_32 : f32 to vector<8x256xf32>
    %56 = arith.mulf %54, %55 : vector<8x256xf32>
    %c0_33 = arith.constant 0 : index
    %c0_34 = arith.constant 0 : index
    %57 = vector.load %arg10[%c0_33, %c0_34] : memref<8x256xf32, #tpu.memory_space<vmem>>, vector<8x256xf32>
    tpu.vector_store %arg10[%c0_33, %c0_34], %56 {strides = array<i32>} : memref<8x256xf32, #tpu.memory_space<vmem>>, vector<8x256xf32>,
    %58 = tpu.transpose %25, [1, 0] : vector<8x16xf32> -> vector<16x8xf32>
    %c0_35 = arith.constant 0 : index
    %c0_36 = arith.constant 0 : index
    %59 = vector.load %arg11[%c0_35, %c0_36] : memref<16x8xf32, #tpu.memory_space<vmem>>, vector<16x8xf32>
    tpu.vector_store %arg11[%c0_35, %c0_36], %58 {strides = array<i32>} : memref<16x8xf32, #tpu.memory_space<vmem>>, vector<16x8xf32>,
    return
  }
  func.func @transform_0(%arg0: i32) -> (i32, i32) {
    %c0_i32 = arith.constant 0 : i32
    %c0_i32_0 = arith.constant 0 : i32
    return %arg0, %c0_i32 : i32, i32
  }
  func.func @transform_1(%arg0: i32) -> (i32, i32) {
    %c0_i32 = arith.constant 0 : i32
    %c0_i32_0 = arith.constant 0 : i32
    return %c0_i32, %arg0 : i32, i32
  }
  func.func @transform_2(%arg0: i32) -> (i32, i32) {
    %c0_i32 = arith.constant 0 : i32
    %c0_i32_0 = arith.constant 0 : i32
    %c0_i32_1 = arith.constant 0 : i32
    return %c0_i32, %c0_i32_0 : i32, i32
  }
  func.func @transform_3(%arg0: i32) -> (i32, i32) {
    %c0_i32 = arith.constant 0 : i32
    %c0_i32_0 = arith.constant 0 : i32
    %c0_i32_1 = arith.constant 0 : i32
    return %c0_i32, %c0_i32_0 : i32, i32
  }
  func.func @transform_4(%arg0: i32) -> (i32, i32) {
    %c0_i32 = arith.constant 0 : i32
    %c0_i32_0 = arith.constant 0 : i32
    %c0_i32_1 = arith.constant 0 : i32
    return %c0_i32, %c0_i32_0 : i32, i32
  }
  func.func @transform_5(%arg0: i32) -> (i32, i32) {
    %c0_i32 = arith.constant 0 : i32
    %c0_i32_0 = arith.constant 0 : i32
    %c0_i32_1 = arith.constant 0 : i32
    return %c0_i32, %c0_i32_0 : i32, i32
  }
  func.func @transform_6(%arg0: i32) -> (i32, i32) {
    %c0_i32 = arith.constant 0 : i32
    %c0_i32_0 = arith.constant 0 : i32
    %c0_i32_1 = arith.constant 0 : i32
    return %c0_i32, %c0_i32_0 : i32, i32
  }
  func.func @transform_7(%arg0: i32) -> (i32, i32) {
    %c0_i32 = arith.constant 0 : i32
    %c0_i32_0 = arith.constant 0 : i32
    %c0_i32_1 = arith.constant 0 : i32
    return %c0_i32, %c0_i32_0 : i32, i32
  }
  func.func @transform_8(%arg0: i32) -> (i32, i32) {
    %c0_i32 = arith.constant 0 : i32
    %c0_i32_0 = arith.constant 0 : i32
    %c0_i32_1 = arith.constant 0 : i32
    return %c0_i32, %c0_i32_0 : i32, i32
  }
  func.func @transform_9(%arg0: i32) -> (i32, i32) {
    %c0_i32 = arith.constant 0 : i32
    %c0_i32_0 = arith.constant 0 : i32
    return %arg0, %c0_i32 : i32, i32
  }
  func.func @transform_10(%arg0: i32) -> (i32, i32) {
    %c0_i32 = arith.constant 0 : i32
    %c0_i32_0 = arith.constant 0 : i32
    return %c0_i32, %arg0 : i32, i32
  }
}

</mosaic_0001>

<bundles_post_ra>
// kernel: vae_forward.1
= control target key start
LH: loop header
LB: loop body
LE: loop exit
PB: predicated region body
PF: predicated region fallthrough
CT: control target
= control target key end

     0   :  { %16 = vsyncpa [#allocation3], 0  ;;  %s1433_s0 = inlined_call_operand.hbm [shape: f32[8,256], index: 0, kind: input, shape index: {}]   ;;  %s1434_s1 = inlined_call_operand.vmem [shape: f32[8,8], index: 1, kind: input, shape index: {}]   ;;  %s1435_s2 = inlined_call_operand.vmem [shape: bf16[256,128], index: 2, kind: input, shape index: {}]   ;;  %s1436_s3 = inlined_call_operand.vmem [shape: bf16[128,64], index: 3, kind: input, shape index: {}]   ;;  %s1437_s4 = inlined_call_operand.vmem [shape: bf16[64,16], index: 4, kind: input, shape index: {}]   ;;  %s1438_s5 = inlined_call_operand.hbm [shape: bf16[8,64], index: 5, kind: input, shape index: {}]   ;;  %s1439_s6 = inlined_call_operand.hbm [shape: bf16[64,128], index: 6, kind: input, shape index: {}]   ;;  %s1440_s7 = inlined_call_operand.hbm [shape: bf16[128,256], index: 7, kind: input, shape index: {}]   ;;  %s1441_s8 = inlined_call_operand.hbm [shape: f32[1,896], index: 8, kind: input, shape index: {}]   ;;  %s1442_s9 = inlined_call_operand.hbm [shape: f32[8,256], index: 9, kind: output, shape index: {0}]   ;;  %s1443_s10 = inlined_call_operand.vmem [shape: f32[16,8], index: 10, kind: output, shape index: {1}]  }
   0x1   :  { %17 = vsyncpa [#allocation6], 0 }
   0x2   :  { %18 = vsyncpa [#allocation9], 0 }
   0x3   :  { %19 = vsyncpa [#allocation4], 0  ;;  %s1223_s13 = smov [#allocation5]   ;;  %s1224_s15 = smov [#allocation8]  }
   0x4   :  { %s44_s14 = sshll.u32 %s1223_s13, 4  ;;  %s65_s16 = sshll.u32 %s1224_s15, 4  ;;  %s45_s14 = int_to_ptr.vmem [resolvable:$true] %s44_s14  ;;  %s66_s16 = int_to_ptr.vmem [resolvable:$true] %s65_s16 }
   0x5   :  { %s1103_s17 = scalar_lea.vmem %s45_s14, 64  ;;  %p1108_p1 = scmp.lt.s32.totalorder %s45_s14, %s45_s14 }
   0x6   :  { %p1104_p0 = scmp.ne.s32.totalorder %s45_s14, %s1103_s17  ;;  %p1109_p2 = scmp.lt.s32.totalorder %s1103_s17, %s1103_s17 }
   0x8   :  { %p1110_p3 = por %p1109_p2, %p1108_p1 }
   0xa   :  { %p1111_p4 = pnand %p1110_p3, %p1104_p0 }
   0xc   :  { %1114 = shalt.err (!%p1111_p4)
}
   0xd   :  { %47 = dma.hbm_to_vmem [thread:$0]  %s1438_s5, 64, %s45_s14, [#allocation6]  }
   0xe   :  { %s1123_s20 = scalar_lea.vmem %s66_s16, 2048  ;;  %p1128_p6 = scmp.lt.s32.totalorder %s66_s16, %s66_s16 }
   0xf   :  { %p1124_p5 = scmp.ne.s32.totalorder %s66_s16, %s1123_s20  ;;  %p1129_p7 = scmp.lt.s32.totalorder %s1123_s20, %s1123_s20 }
  0x11   :  { %p1130_p8 = por %p1129_p7, %p1128_p6 }
  0x13   :  { %p1131_p9 = pnand %p1130_p8, %p1124_p5 }
  0x15   :  { %1134 = shalt.err (!%p1131_p9)
}
  0x16   :  { %s1225_s21 = smov 128   ;;  %s1226_s22 = smov 8  }
  0x17   :  { %71 = dma.hbm_to_vmem [thread:$0]  %s1440_s7, 2048, %s66_s16, [#allocation9], %s1225_s21, %s1225_s21, %s1226_s22  }
  0x18   :  { %s1227_s25 = smov [#allocation2]   ;;  %s1228_s27 = smov [#allocation7]  }
  0x19   :  { %s26_s26 = sshll.u32 %s1227_s25, 4  ;;  %s53_s28 = sshll.u32 %s1228_s27, 4  ;;  %s27_s26 = int_to_ptr.vmem [resolvable:$true] %s26_s26  ;;  %s54_s28 = int_to_ptr.vmem [resolvable:$true] %s53_s28 }
  0x1a   :  { %s1143_s5 = scalar_lea.vmem %s27_s26, 256  ;;  %p1148_p11 = scmp.lt.s32.totalorder %s27_s26, %s27_s26 }
  0x1b   :  { %p1144_p10 = scmp.ne.s32.totalorder %s27_s26, %s1143_s5  ;;  %p1149_p12 = scmp.lt.s32.totalorder %s1143_s5, %s1143_s5 }
  0x1d   :  { %p1150_p13 = por %p1149_p12, %p1148_p11 }
  0x1f   :  { %p1151_p0 = pnand %p1150_p13, %p1144_p10 }
  0x21   :  { %1154 = shalt.err (!%p1151_p0)
}
  0x22   :  { %29 = dma.hbm_to_vmem [thread:$0]  %s1433_s0, 256, %s27_s26, [#allocation3]  }
  0x23   :  { %s1163_s11 = scalar_lea.vmem %s54_s28, 512  ;;  %p1168_p2 = scmp.lt.s32.totalorder %s54_s28, %s54_s28 }
  0x24   :  { %p1164_p1 = scmp.ne.s32.totalorder %s54_s28, %s1163_s11  ;;  %p1169_p3 = scmp.lt.s32.totalorder %s1163_s11, %s1163_s11 }
  0x26   :  { %p1170_p4 = por %p1169_p3, %p1168_p2 }
  0x28   :  { %p1171_p5 = pnand %p1170_p4, %p1164_p1 }
  0x2a   :  { %1174 = shalt.err (!%p1171_p5)
}
  0x2b   :  { %s1229_s7 = smov 64   ;;  %s1230_s12 = smov 4  }
  0x2c   :  { %59 = dma.hbm_to_vmem [thread:$0]  %s1439_s6, 512, %s54_s28, [#allocation6], %s1229_s7, %s1229_s7, %s1230_s12  }
  0x2d   :  { %s1231_s15 = smov [#allocation10]  }
  0x2e   :  { %s78_s16 = sshll.u32 %s1231_s15, 4  ;;  %s79_s16 = int_to_ptr.vmem [resolvable:$true] %s78_s16 }
  0x2f   :  { %s1183_s17 = scalar_lea.vmem %s79_s16, 112  ;;  %s1187_s18 = scalar_lea.vmem %s79_s16, 128 }
  0x30   :  { %p1184_p6 = scmp.ne.s32.totalorder %s79_s16, %s1183_s17  ;;  %p1188_p7 = scmp.lt.s32.totalorder %s79_s16, %s79_s16 }
  0x31   :  { %p1189_p8 = scmp.lt.s32.totalorder %s1187_s18, %s1183_s17 }
  0x33   :  { %p1190_p9 = por %p1189_p8, %p1188_p7 }
  0x35   :  { %p1191_p10 = pnand %p1190_p9, %p1184_p6 }
  0x37   :  { %1194 = shalt.err (!%p1191_p10)
}
  0x38   :  { %81 = dma.hbm_to_vmem [thread:$0]  %s1441_s8, 112, %s79_s16, [#allocation9]  }
  0x39   :  { %1215 = dma.done.wait [#allocation3], 256  }
  0x3a   :  { %1216 = vsyncadd [#allocation3], 4294967040 }
  0x3b   :  { %1217 = dma.done.wait [#allocation6], 576  }
  0x3c   :  { %1218 = vsyncadd [#allocation6], 4294966720 }
  0x3d   :  { %1219 = dma.done.wait [#allocation9], 2160  }
  0x3e   :  { %1220 = vsyncadd [#allocation9], 4294965136  ;;  %v1232_v0 = vmov 0.0   ;;  %v1033_v1 = vld [vmem:[%s1435_s2 + $0x78] sm:$0xff]   ;;  %v1035_v3 = vld [vmem:[%s1435_s2 + $0x70] sm:$0xff]   ;;  %vm1233_vm0 = vmmov 0  }
  0x3f   :  { %969 = vmatprep.subr.bf16.mxu1 %v1232_v0  ;;  %v1034_v2 = vld [vmem:[%s1435_s2 + $0x38] sm:$0xff]   ;;  %926 = vmatprep.subr.bf16.mxu0 %v1033_v1  ;;  %v1036_v4 = vld [vmem:[%s1435_s2 + $0x30] sm:$0xff]   ;;  %v1037_v5 = vld [vmem:[%s1435_s2 + $0x68] sm:$0xff]   ;;  %vm434_vm1 = vcmask 523264   ;;  %vm532_vm2 = vcmask 1043456   ;;  %vm528_vm3 = vcmask 64512  }
  0x40   :  { %927 = vmatpush3.bf16.msra.mxu0 %v1034_v2  ;;  %v1038_v6 = vld [vmem:[%s1435_s2 + $0x28] sm:$0xff]   ;;  %v1039_v7 = vld [vmem:[%s1435_s2 + $0x60] sm:$0xff]   ;;  %v1041_v9 = vld [vmem:[%s1435_s2 + $0x58] sm:$0xff]   ;;  %985 = vmatprep.mubr.msk.bf16.mxu1 %vm1233_vm0, %v1232_v0  ;;  %s1236_s27 = smov [#allocation11]  }
  0x41   :  { %928 = vmatprep.subr.bf16.mxu0 %v1035_v3  ;;  %v1040_v8 = vld [vmem:[%s1435_s2 + $0x20] sm:$0xff]   ;;  %v1042_v10 = vld [vmem:[%s1435_s2 + $0x18] sm:$0xff]   ;;  %v1043_v11 = vld [vmem:[%s1435_s2 + $0x50] sm:$0xff]   ;;  %s855_s28 = sshll.u32 %s1236_s27, 4  ;;  %s856_s28 = int_to_ptr.vmem [resolvable:$true] %s855_s28 }
  0x42   :  { %v105_v12 = vld [vmem:[#allocation2 + $0x8] sm:$0xff]  ;;  %v1049_v14 = vld [vmem:[%s1436_s3 + $0x38] sm:$0xff]   ;;  %v1044_v15 = vld [vmem:[%s1435_s2 + $0x10] sm:$0xff]   ;;  %p1200_p12 = scmp.lt.s32.totalorder %s856_s28, %s856_s28 }
  0x43   :  { %v107_v13 = vpack.c.bf16 %v105_v12, %v105_v12  ;;  %v1045_v16 = vld [vmem:[%s1435_s2 + $0x48] sm:$0xff]   ;;  %970 = vmatpush3.bf16.msra.mxu1 %v1049_v14  ;;  %v1050_v17 = vld [vmem:[%s1436_s3 + $0x30] sm:$0xff]   ;;  %v1047_v19 = vld [vmem:[%s1435_s2 + $0x40] sm:$0xff]  }
  0x44   :  { %929 = vmatpush3.bf16.msra.mxu0 %v1036_v4  ;;  %v1046_v18 = vld [vmem:[%s1435_s2 + $0x8] sm:$0xff]   ;;  %971 = vmatprep.subr.bf16.mxu1 %v1232_v0  ;;  %v1048_v21 = vld [vmem:[%s1435_s2] sm:$0xff]   ;;  %v1053_v25 = vld [vmem:[%s1436_s3 + $0x18] sm:$0xff]  }
  0x45   :  { %930 = vmatprep.subr.bf16.mxu0 %v1037_v5  ;;  %274 = vmatprep.mubr.bf16.mxu0 %v107_v13  ;;  %v1051_v20 = vld [vmem:[%s1436_s3 + $0x28] sm:$0xff]   ;;  %v104_v22 = vld [vmem:[#allocation2] sm:$0xff]  ;;  %v1054_v26 = vld [vmem:[%s1436_s3 + $0x10] sm:$0xff]  }
  0x46   :  { %v1052_v23 = vld [vmem:[%s1436_s3 + $0x20] sm:$0xff]   ;;  %v106_v24 = vpack.c.bf16 %v104_v22, %v104_v22  ;;  %v1055_v27 = vld [vmem:[%s1436_s3 + $0x8] sm:$0xff]   ;;  %v870_v30 = vld [vmem:[#allocation10] ss:$0 sm:$0xff] }
  0x47   :  { %972 = vmatpush3.bf16.msra.mxu1 %v1050_v17  ;;  %v1056_v28 = vld [vmem:[%s1436_s3] sm:$0xff]   ;;  %v1057_v37 = vld [vmem:[%s1437_s4 + $0x18] sm:$0xff]   ;;  %v1058_v39 = vld [vmem:[%s1437_s4 + $0x10] sm:$0xff]  }
  0x48   :  { %931 = vmatpush3.bf16.msra.mxu0 %v1038_v6  ;;  %973 = vmatprep.subr.bf16.mxu1 %v1232_v0  ;;  %v1059_v40 = vld [vmem:[%s1437_s4 + $0x8] sm:$0xff]   ;;  %v1060_v41 = vld [vmem:[%s1437_s4] sm:$0xff]   ;;  %v887_v42 = vld [vmem:[#allocation10 + $0x1] ss:$0 sm:$0xff]  ;;  %s1234_s4 = smov 120  }
  0x49   :  { %932 = vmatprep.subr.bf16.mxu0 %v1039_v7  ;;  %v896_v50 = vld [vmem:[#allocation10 + $0x2] ss:$0 sm:$0xff]  ;;  %v521_v58 = vld [vmem:[#allocation5] sm:$0xf]  ;;  %v478_v61 = vld [vmem:[%s1434_s1] sm:$0xff] }
  0x4a   :  { %v534_v59 = vsel %vm532_vm2, %v521_v58, 0  ;;  %v1061_v3 = vld [vmem:[#allocation7 + $0x18] sm:$0xff]   ;;  %v1062_v5 = vld [vmem:[#allocation7 + $0x10] sm:$0xff]   ;;  %v1063_v6 = vld [vmem:[#allocation7 + $0x8] sm:$0xff]  }
  0x4b   :  { %974 = vmatpush3.bf16.msra.mxu1 %v1051_v20  ;;  %v1064_v7 = vld [vmem:[#allocation7] sm:$0xff]   ;;  %v1073_v12 = vld [vmem:[#allocation8 + $0x54] ss:$8 sps:$4 sm:$0xff]   ;;  %v1071_v13 = vld [vmem:[#allocation8 + $0x50] ss:$8 sps:$4 sm:$0xff]  }
  0x4c   :  { %933 = vmatpush3.bf16.msra.mxu0 %v1040_v8  ;;  %975 = vmatprep.subr.bf16.mxu1 %v1232_v0  ;;  %v1065_v8 = vld [vmem:[#allocation8 + $0x70] ss:$8 sps:$4 sm:$0xff]   ;;  %v1076_v14 = vld [vmem:[#allocation8 + $0x44] ss:$8 sps:$4 sm:$0xff]  }
  0x4d   :  { %934 = vmatprep.subr.bf16.mxu0 %v1041_v9  ;;  %v1067_v9 = vld [vmem:[#allocation8 + $0x74] ss:$8 sps:$4 sm:$0xff]   ;;  %v1082_v17 = vld [vmem:[#allocation8 + $0x24] ss:$8 sps:$4 sm:$0xff]   ;;  %v1083_v20 = vld [vmem:[#allocation8 + $0x10] ss:$8 sps:$4 sm:$0xff]  }
  0x4f   :  { %976 = vmatpush3.bf16.msra.mxu1 %v1052_v23 }
  0x50   :  { %935 = vmatpush3.bf16.msra.mxu0 %v1042_v10  ;;  %977 = vmatprep.subr.bf16.mxu1 %v1232_v0  ;;  %v1070_v10 = vld [vmem:[#allocation8 + $0x64] ss:$8 sps:$4 sm:$0xff]  }
  0x51   :  { %936 = vmatprep.subr.bf16.mxu0 %v1043_v11  ;;  %v1068_v11 = vld [vmem:[#allocation8 + $0x60] ss:$8 sps:$4 sm:$0xff]  }
  0x53   :  { %978 = vmatpush3.bf16.msra.mxu1 %v1053_v25 }
  0x54   :  { %937 = vmatpush3.bf16.msra.mxu0 %v1044_v15  ;;  %979 = vmatprep.subr.bf16.mxu1 %v1232_v0  ;;  %v1074_v15 = vld [vmem:[#allocation8 + $0x40] ss:$8 sps:$4 sm:$0xff]  }
  0x55   :  { %938 = vmatprep.subr.bf16.mxu0 %v1045_v16  ;;  %v1079_v16 = vld [vmem:[#allocation8 + $0x34] ss:$8 sps:$4 sm:$0xff]  }
  0x57   :  { %980 = vmatpush3.bf16.msra.mxu1 %v1054_v26 }
  0x58   :  { %939 = vmatpush3.bf16.msra.mxu0 %v1046_v18  ;;  %981 = vmatprep.subr.bf16.mxu1 %v1232_v0  ;;  %v1080_v18 = vld [vmem:[#allocation8 + $0x20] ss:$8 sps:$4 sm:$0xff]  }
  0x59   :  { %940 = vmatprep.subr.bf16.mxu0 %v1047_v19  ;;  %v1085_v19 = vld [vmem:[#allocation8 + $0x14] ss:$8 sps:$4 sm:$0xff]  }
  0x5b   :  { %982 = vmatpush3.bf16.msra.mxu1 %v1055_v27 }
  0x5c   :  { %941 = vmatpush3.bf16.msra.mxu0 %v1048_v21  ;;  %983 = vmatprep.subr.bf16.mxu1 %v1232_v0  ;;  %v902_v21 = vld [vmem:[#allocation10 + $0x3] ss:$0 sm:$0xff] }
  0x5d   :  { %768 = vmatprep.subr.bf16.mxu0 %v1067_v9 }
  0x5f   :  { %275 = vmatmul.mubr.bf16.vlgmr.msra.gmra.mxu0 %v106_v24  ;;  %984 = vmatpush3.bf16.msra.mxu1 %v1056_v28 }
  0x60   :  { %989 = vmatprep.subr.bf16.mxu1 %v1232_v0  ;;  %769 = vmatpush1.bf16.msra.mxu0 %v1065_v8 }
  0x61   :  { %770 = vmatprep.subr.bf16.mxu0 %v1070_v10 }
  0x64   :  { %771 = vmatpush1.bf16.msra.mxu0 %v1068_v11 }
  0x65   :  { %772 = vmatprep.subr.bf16.mxu0 %v1073_v12 }
  0x68   :  { %773 = vmatpush1.bf16.msra.mxu0 %v1071_v13 }
  0x69   :  { %774 = vmatprep.subr.bf16.mxu0 %v1076_v14 }
  0x6c   :  { %775 = vmatpush1.bf16.msra.mxu0 %v1074_v15 }
  0x6d   :  { %776 = vmatprep.subr.bf16.mxu0 %v1079_v16 }
 0x11f   :  { %v942_v29 = vpop.f32.mrf.mxu0 }
 0x121   :  { %v943_v31 = vpop.f32.mrf.mxu0 }
 0x122   :  { %v944_v32 = vadd.f32 %v943_v31, %v942_v29  ;;  %v1088_v29 = vld [vmem:[#allocation8 + $0x4] ss:$8 sps:$4 sm:$0xff]   ;;  %v1235_v31 = vmov 0  }
 0x123   :  { %v945_v33 = vpop.f32.mrf.mxu0  ;;  %800 = vmatprep.mubr.bf16.mxu0 %v1235_v31 }
 0x124   :  { %v277_v34 = vadd.f32 %v944_v32, %v870_v30  ;;  %v1086_v30 = vld [vmem:[#allocation8] ss:$8 sps:$4 sm:$0xff]   ;;  %v904_v32 = vld [vmem:[#allocation10 + $0x4] ss:$0 sm:$0xff] }
 0x125   :  { %v946_v35 = vpop.f32.mrf.mxu0 }
 0x126   :  { %v282_v36 = vmax.f32 %v277_v34, 0.0 }
 0x128   :  { %v283_v38 = vpack.c.bf16 %v282_v36, %v282_v36 }
 0x12a   :  { %986 = vmatmul.mubr.bf16.vlgmr.msra.gmra.mxu1 %v283_v38 }
 0x12b   :  { %990 = vmatpush3.bf16.msra.mxu1 %v1057_v37  ;;  %997 = vmatprep.mubr.msk.bf16.mxu1 %vm1233_vm0, %v1232_v0 }
 0x12c   :  { %991 = vmatprep.subr.bf16.mxu1 %v1232_v0 }
 0x12f   :  { %992 = vmatpush3.bf16.msra.mxu1 %v1058_v39 }
 0x130   :  { %993 = vmatprep.subr.bf16.mxu1 %v1232_v0 }
 0x133   :  { %994 = vmatpush3.bf16.msra.mxu1 %v1059_v40 }
 0x134   :  { %995 = vmatprep.subr.bf16.mxu1 %v1232_v0 }
 0x137   :  { %996 = vmatpush3.bf16.msra.mxu1 %v1060_v41 }
 0x138   :  { %1001 = vmatprep.subr.bf16.mxu1 %v1232_v0 }
 0x1ea   :  { %v388_v43 = vpop.f32.mrf.mxu1 }
 0x1eb   :  { %v389_v44 = vadd.f32 %v887_v42, %v388_v43  ;;  %v678_v42 = vlaneseq }
 0x1ec   :  { %v987_v45 = vpop.f32.mrf.mxu1 }
 0x1ed   :  { %v394_v46 = vmax.f32 %v389_v44, 0.0  ;;  %v679_v43 = vshrl.u32 %v678_v42, 7  ;;  %v103_v45 = vld [vmem:[#allocation10 + $0x5] sm:$0x3] }
 0x1ee   :  { %v391_v47 = vpop.f32.mrf.mxu1 }
 0x1ef   :  { %v395_v48 = vpack.c.bf16 %v394_v46, %v394_v46  ;;  %v680_v44 = vsub.s32 0, %v679_v43  ;;  %v684_v46 = vsub.s32 1, %v679_v43 }
 0x1f0   :  { %v988_v49 = vpop.f32.mrf.mxu1 }
 0x1f1   :  { %998 = vmatmul.mubr.msk.bf16.vlgmr.msra.gmra.mxu1 %vm434_vm1, %v395_v48  ;;  %v681_v47 = vrot.slane %v103_v45, %v680_v44  ;;  %v685_v48 = vrot.slane %v103_v45, %v684_v46 }
 0x1f2   :  { %1003 = vmatprep.mubr.msk.bf16.mxu1 %vm1233_vm0, %v1232_v0  ;;  %1002 = vmatpush3.bf16.msra.mxu1 %v534_v59 }
 0x1f3   :  { %1007 = vmatprep.subr.bf16.mxu1 %v1232_v0 }
 0x2b1   :  { %v472_v51 = vpop.f32.mrf.mxu1 }
 0x2b2   :  { %v473_v52 = vadd.f32 %v896_v50, %v472_v51 }
 0x2b3   :  { %v999_v53 = vpop.f32.mrf.mxu1 }
 0x2b4   :  { %v511_v54 = vmul.f32 0.5, %v473_v52  ;;  %815 = vxpose.xlu1.b32.start.end [1/1] (short) (narrow) %v473_v52, 16 }
 0x2b5   :  { %v475_v55 = vpop.f32.mrf.mxu1 }
 0x2b6   :  { %v512_v56 = vmul.f32 1.442695, %v511_v54 }
 0x2b7   :  { %v1000_v57 = vpop.f32.mrf.mxu1 }
 0x2b8   :  { %1089 = vpow2.f32 %v512_v56 }
 0x2c5   :  { %v1090_v60 = vpop.eup %1089 }
 0x2c6   :  { %515 = vrot.lane.b32.xlu0 %v1090_v60, %s1234_s4 }
 0x2e4   :  { %479 = vxpose.xlu0.b32.start.end [1/1] (short) (narrow) %v478_v61, 8 }
 0x330   :  { %v831_v40 = vpop.trf.xlu1 }
 0x331   :  { %847 = vst.msk [vmem:[%s1443_s10] sm:$0xff] %vm528_vm3, %v831_v40 }
 0x334   :  { %v832_v41 = vpop.trf.xlu1 }
 0x335   :  { %848 = vst.msk [vmem:[%s1443_s10 + $0x8] sm:$0xff] %vm528_vm3, %v832_v41  ;;  %s1195_s10 = scalar_lea.vmem %s856_s28, 256 }
 0x336   :  { %p1196_p11 = scmp.ne.s32.totalorder %s856_s28, %s1195_s10  ;;  %p1201_p13 = scmp.lt.s32.totalorder %s1195_s10, %s1195_s10 }
 0x338   :  { %v516_v62 = vpop.permute.xlu0 %515  ;;  %p1202_p0 = por %p1201_p13, %p1200_p12 }
 0x33a   :  { %p1203_p1 = pnand %p1202_p0, %p1196_p11 }
 0x360   :  { %v495_v63 = vpop.trf.xlu0 }
 0x361   :  { %v518_v1 = vmul.f32 %v516_v62, %v495_v63 }
 0x363   :  { %v519_v2 = vadd.f32 %v518_v1, %v473_v52 }
 0x365   :  { %v520_v4 = vpack.c.bf16 %v519_v2, %v519_v2 }
 0x367   :  { %1004 = vmatmul.mubr.msk.bf16.vlgmr.msra.gmra.mxu1 %vm528_vm3, %v520_v4 }
 0x368   :  { %1008 = vmatpush3.bf16.msra.mxu1 %v1061_v3  ;;  %1015 = vmatprep.mubr.msk.bf16.mxu1 %vm1233_vm0, %v1232_v0 }
 0x369   :  { %1009 = vmatprep.subr.bf16.mxu1 %v1232_v0 }
 0x36c   :  { %1010 = vmatpush3.bf16.msra.mxu1 %v1062_v5 }
 0x36d   :  { %1011 = vmatprep.subr.bf16.mxu1 %v1232_v0 }
 0x370   :  { %1012 = vmatpush3.bf16.msra.mxu1 %v1063_v6 }
 0x371   :  { %1013 = vmatprep.subr.bf16.mxu1 %v1232_v0  ;;  %v1077_v0 = vld [vmem:[#allocation8 + $0x30] ss:$8 sps:$4 sm:$0xff]  }
 0x372   :  { %777 = vmatpush1.bf16.msra.mxu0 %v1077_v0 }
 0x373   :  { %778 = vmatprep.subr.bf16.mxu0 %v1082_v17 }
 0x374   :  { %1014 = vmatpush3.bf16.msra.mxu1 %v1064_v7 }
 0x376   :  { %779 = vmatpush1.bf16.msra.mxu0 %v1080_v18 }
 0x377   :  { %780 = vmatprep.subr.bf16.mxu0 %v1085_v19 }
 0x37a   :  { %781 = vmatpush1.bf16.msra.mxu0 %v1083_v20 }
 0x37b   :  { %782 = vmatprep.subr.bf16.mxu0 %v1088_v29 }
 0x37e   :  { %783 = vmatpush1.bf16.msra.mxu0 %v1086_v30 }
 0x427   :  { %v570_v22 = vpop.f32.mrf.mxu1 }
 0x428   :  { %v571_v23 = vadd.f32 %v902_v21, %v570_v22 }
 0x429   :  { %v1005_v24 = vpop.f32.mrf.mxu1 }
 0x42a   :  { %v576_v25 = vmax.f32 %v571_v23, 0.0 }
 0x42b   :  { %v573_v26 = vpop.f32.mrf.mxu1 }
 0x42c   :  { %v577_v27 = vpack.c.bf16 %v576_v25, %v576_v25 }
 0x42d   :  { %v1006_v28 = vpop.f32.mrf.mxu1 }
 0x42e   :  { %1016 = vmatmul.mubr.msk.bf16.vlgmr.msra.gmra.mxu1 %vm434_vm1, %v577_v27 }
 0x4ee   :  { %v653_v33 = vpop.f32.mrf.mxu1 }
 0x4ef   :  { %v654_v34 = vadd.f32 %v904_v32, %v653_v33 }
 0x4f0   :  { %v1017_v35 = vpop.f32.mrf.mxu1 }
 0x4f1   :  { %v659_v36 = vmax.f32 %v654_v34, 0.0 }
 0x4f2   :  { %v656_v37 = vpop.f32.mrf.mxu1 }
 0x4f3   :  { %v660_v38 = vpack.c.bf16 %v659_v36, %v659_v36 }
 0x4f4   :  { %v1018_v39 = vpop.f32.mrf.mxu1 }
 0x4f5   :  { %801 = vmatmul.mubr.bf16.vlgmr.msra.gmra.mxu0 %v660_v38 }
 0x5b5   :  { %v802_v49 = vpop.f32.mrf.mxu0 }
 0x5b6   :  { %v803_v50 = vadd.f32 %v802_v49, %v681_v47 }
 0x5b7   :  { %v804_v51 = vpop.f32.mrf.mxu0 }
 0x5b8   :  { %1091 = vtanh.f32 %v803_v50  ;;  %v805_v52 = vadd.f32 %v804_v51, %v685_v48 }
 0x5b9   :  { %v806_v53 = vpop.f32.mrf.mxu0 }
 0x5ba   :  { %1093 = vtanh.f32 %v805_v52 }
 0x5bb   :  { %v807_v54 = vpop.f32.mrf.mxu0 }
 0x5c5   :  { %v1092_v55 = vpop.eup %1091 }
 0x5c6   :  { %v811_v56 = vmul.f32 6.0, %v1092_v55 }
 0x5c7   :  { %v1094_v57 = vpop.eup %1093 }
 0x5c8   :  { %813 = vst [vmem:[#allocation11] sm:$0xff] %v811_v56  ;;  %v812_v58 = vmul.f32 6.0, %v1094_v57 }
 0x5ca   :  { %814 = vst [vmem:[#allocation11 + $0x8] sm:$0xff] %v812_v58 }
 0x5cb   :  { %1206 = shalt.err (!%p1203_p1)
}
 0x5cc   :  { %858 = dma.vmem_to_hbm [thread:$0]  %s856_s28, 256, %s1442_s9, [#allocation4]  }
 0x5cd   :  { %1221 = dma.done.wait [#allocation4], 256  }
 0x5ce   :  { %1222 = vsyncadd [#allocation4], 4294967040 }
 0x5cf   :  { %866 = vsyncpa [#allocation3], 1 }
 0x5d0   :  { %867 = vsyncpa [#allocation6], 1 }
 0x5d1   :  { %868 = vsyncpa [#allocation9], 1 }
 0x5d2   :  { %869 = vsyncpa [#allocation4], 1 }

</bundles_post_ra>
